<compile_context>
chip_gen: v7x
topology: tpu7x:2x2x1
jax: 0.10.0
libtpu: 0.0.40
codegen_flags: <defaults>
</compile_context>

<pallas_src>
import jax
import jax.numpy as jnp
from jax.experimental import pallas as pl
from jax.experimental.pallas import tpu as pltpu

_TARGET_BLOCK_BYTES = 4 * 1024 * 1024   # ~4 MiB per x (and y) block
_SMALL_LEVEL_BYTES = 1 << 20            # levels below this skip Pallas entirely


def _round_up(v, m):
    return ((v + m - 1) // m) * m


def _choose_tiles(nc, hw, itemsize, target):
    """Pick (row_block, lane_block) honoring the (8,128)/full-dim rule, no padding."""
    sub = max(8, 32 // itemsize)                 # sublane quantum: f32->8, bf16->16
    row_bytes = hw * itemsize
    if sub * row_bytes <= target:
        # Whole lane axis fits one block: keep a full-hw lane-dense block, grow rows.
        lane_blk = hw                            # == full array dim (any size OK)
        br = (target // row_bytes) // sub * sub
        br = max(sub, br)
        br = min(br, _round_up(nc, sub))
        # Keep >= 2 row blocks so ("parallel", ...) shards across both v7x TCs.
        if nc >= 2 * sub:
            br = min(br, _round_up(pl.cdiv(nc, 2), sub))
    else:
        # Very large spatial: tile the lane axis in 128-multiples (tail is masked).
        br = sub
        lane_blk = (target // (sub * itemsize)) // 128 * 128
        lane_blk = max(128, min(lane_blk, _round_up(hw, 128)))
    if nc < sub:
        br = nc                                  # == full array dim (any size OK)
    # If the whole level still fits one block, split the lane axis so both v7x
    # TensorCores get work (tiny per-step cost, level is <= one block anyway).
    if pl.cdiv(nc, br) * pl.cdiv(hw, lane_blk) == 1 and hw >= 256:
        lane_blk = _round_up(pl.cdiv(hw, 2), 128)
    return br, lane_blk


def affine_kernel(x_ref, scale_ref, shift_ref, y_ref):
    """One fused affine over a lane-dense block.

    x_ref     : (BR, LANE)  activations (f32 or bf16)
    scale_ref : (BR, 1)     composed per-row scale (f32, broadcast over lanes)
    shift_ref : (BR, 1)     composed per-row shift (f32)
    y_ref     : (BR, LANE)  transformed activations (same dtype as x)
    """
    x = x_ref[...].astype(jnp.float32)
    y_ref[...] = (x * scale_ref[...] + shift_ref[...]).astype(y_ref.dtype)


def _affine_level(x_2d, scale_rows, shift_rows, *, target_block_bytes=_TARGET_BLOCK_BYTES):
    """Apply the composed per-row affine to one pyramid level ((N*C, H*W) layout)."""
    nc, hw = x_2d.shape
    itemsize = jnp.dtype(x_2d.dtype).itemsize
    br, lane_blk = _choose_tiles(nc, hw, itemsize, target_block_bytes)
    grid = (pl.cdiv(nc, br), pl.cdiv(hw, lane_blk))

    sc = scale_rows.reshape(nc, 1).astype(jnp.float32)
    sh = shift_rows.reshape(nc, 1).astype(jnp.float32)

    block_bytes = br * lane_blk * itemsize
    # x + y double-buffered = 4 blocks, plus generous headroom for params/scratch.
    vmem_limit = int(min(32 * 1024 * 1024, 4 * block_bytes + 8 * 1024 * 1024))

    return pl.pallas_call(
        affine_kernel,
        out_shape=jax.ShapeDtypeStruct((nc, hw), x_2d.dtype),
        grid_spec=pltpu.PrefetchScalarGridSpec(
            num_scalar_prefetch=0,
            grid=grid,
            in_specs=[
                pl.BlockSpec((br, lane_blk), lambda i, j: (i, j)),
                pl.BlockSpec((br, 1), lambda i, j: (i, 0)),
                pl.BlockSpec((br, 1), lambda i, j: (i, 0)),
            ],
            out_specs=pl.BlockSpec((br, lane_blk), lambda i, j: (i, j)),
        ),
        compiler_params=pltpu.CompilerParams(
            dimension_semantics=("parallel", "parallel"),
            vmem_limit_bytes=vmem_limit,
        ),
        # NOTE: input_output_aliases={0: 0} would halve the peak HBM footprint,
        # but it would clobber the caller-visible input buffer; left off for safety.
    )(x_2d, sc, sh)


def sequential_net_forward(inputs, logdets, params, *, small_level_bytes=_SMALL_LEVEL_BYTES):
    """Pallas-backed SequentialNet.forward.

    inputs : tuple of pyramid levels, each (N, C, H, W)
    logdets: (N,) float
    params : list over levels of (s, b), each (M, C) -- log-scale / shift of
             each of the M chained flow modules.
    """
    outputs = []
    ld = logdets.astype(jnp.float32)
    for x, (s, b) in zip(inputs, params):
        n, c, h, w = x.shape
        s32 = s.astype(jnp.float32)
        b32 = b.astype(jnp.float32)

        # --- algebraic collapse of the M-module chain (tiny (M, C) math) ---
        total_s = jnp.sum(s32, axis=0)                               # (C,)
        suffix_excl = jnp.cumsum(s32[::-1], axis=0)[::-1] - s32      # sum_{k>m} s_k
        scale_c = jnp.exp(total_s)                                   # (C,)
        shift_c = jnp.sum(b32 * jnp.exp(suffix_excl), axis=0)        # (C,)

        # --- logdet: independent of x, identical across the batch -> wrapper ---
        ld = ld + jnp.float32(h * w) * jnp.sum(s32)

        level_bytes = n * c * h * w * jnp.dtype(x.dtype).itemsize
        if level_bytes < small_level_bytes:
            # Tiny level: plain elementwise (XLA fuses it; no pallas dispatch cost).
            y = (x.astype(jnp.float32) * scale_c[None, :, None, None]
                 + shift_c[None, :, None, None]).astype(x.dtype)
        else:
            # rows = (batch, channel) pairs, channel fastest; H*W on the lane axis.
            x_2d = x.reshape(n * c, h * w)
            y = _affine_level(x_2d, jnp.tile(scale_c, n), jnp.tile(shift_c, n))
            y = y.reshape(n, c, h, w)
        outputs.append(y)
    return tuple(outputs), ld


def reference_forward(inputs, logdets, params):
    """Pure-JAX re-implementation of the SequentialNet module chain."""
    n_modules = params[0][0].shape[0]
    outputs = tuple(inputs)
    ld = logdets
    for m in range(n_modules):                      # SequentialNet loop
        new_outputs = []
        for x, (s, b) in zip(outputs, params):      # per pyramid level
            s_m, b_m = s[m], b[m]                   # (C,)
            y = x * jnp.exp(s_m)[None, :, None, None] + b_m[None, :, None, None]
            ld = ld + x.shape[2] * x.shape[3] * jnp.sum(s_m)
            new_outputs.append(y)
        outputs = tuple(new_outputs)
    return tuple(outputs), ld


if __name__ == "__main__":
    key = jax.random.PRNGKey(0)
    N, M = 2, 3
    # (C, H, W) per pyramid level; the second one has a non-128-multiple H*W and
    # enough rows for >= 2 row blocks (exercises tail masking, no padding path).
    level_specs = [(4, 64, 64), (12, 40, 24), (4, 16, 16), (4, 8, 8)]

    keys = jax.random.split(key, 1 + 3 * len(level_specs))
    k_it = iter(keys)

    inputs = tuple(
        jax.random.normal(next(k_it), (N, c, h, w), dtype=jnp.float32)
        for (c, h, w) in level_specs
    )
    logdets = jax.random.normal(next(k_it), (N,), dtype=jnp.float32)
    params = [
        (
            0.1 * jax.random.normal(next(k_it), (M, c), dtype=jnp.float32),  # log-scales
            0.1 * jax.random.normal(next(k_it), (M, c), dtype=jnp.float32),  # shifts
        )
        for (c, _, _) in level_specs
    ]

    ref_outs, ref_lds = reference_forward(inputs, logdets, params)

    # 1) Force every level through the Pallas kernel.
    outs, lds = sequential_net_forward(inputs, logdets, params, small_level_bytes=0)
    outs = jax.block_until_ready(outs)
    lds = jax.block_until_ready(lds)
    for a, b in zip(outs, ref_outs):
        assert jnp.allclose(a, b, atol=1e-5, rtol=1e-5)
    assert jnp.allclose(lds, ref_lds, atol=1e-4, rtol=1e-5)

    # 2) Default dispatch (tiny levels take the fused-XLA fast path).
    outs2, lds2 = sequential_net_forward(inputs, logdets, params)
    outs2 = jax.block_until_ready(outs2)
    for a, b in zip(outs2, ref_outs):
        assert jnp.allclose(a, b, atol=1e-5, rtol=1e-5)
    assert jnp.allclose(lds2, ref_lds, atol=1e-4, rtol=1e-5)

    # 3) Direct kernel checks: 2-D lane tiling with masked tails, and bf16 I/O.
    xk = jax.random.normal(jax.random.PRNGKey(1), (16, 5000), dtype=jnp.float32)
    sck = jnp.linspace(0.5, 1.5, 16, dtype=jnp.float32)
    shk = jnp.linspace(-1.0, 1.0, 16, dtype=jnp.float32)
    yk = jax.block_until_ready(_affine_level(xk, sck, shk, target_block_bytes=64 * 1024))
    yk_ref = xk * sck[:, None] + shk[:, None]
    assert jnp.allclose(yk, yk_ref, atol=1e-5, rtol=1e-5)

    xb = xk.astype(jnp.bfloat16)
    yb = jax.block_until_ready(_affine_level(xb, sck, shk, target_block_bytes=64 * 1024))
    yb_ref = (xb.astype(jnp.float32) * sck[:, None] + shk[:, None]).astype(jnp.bfloat16)
    assert jnp.allclose(yb.astype(jnp.float32), yb_ref.astype(jnp.float32),
                        atol=1e-2, rtol=1e-2)

    print("KERNEL_OK")
</pallas_src>

<mosaic_0001>
module attributes {stable_mosaic.version = 11 : i64} {
  func.func @affine_kernel(%arg0: i32, %arg1: i32, %arg2: memref<8x2048xf32, #tpu.memory_space<vmem>>, %arg3: memref<8x1xf32, #tpu.memory_space<vmem>>, %arg4: memref<8x1xf32, #tpu.memory_space<vmem>>, %arg5: memref<8x2048xf32, #tpu.memory_space<vmem>>) attributes {dimension_semantics = [#tpu.dimension_semantics<parallel>, #tpu.dimension_semantics<parallel>], iteration_bounds = array<i64: 1, 2>, scalar_prefetch = 0 : i64, scratch_operands = 0 : i64, tpu.core_type = #tpu.core_type<tc>, window_params = [{transform_indices = @transform_0, window_bounds = array<i64: 8, 2048>}, {transform_indices = @transform_1, window_bounds = array<i64: 8, 1>}, {transform_indices = @transform_2, window_bounds = array<i64: 8, 1>}, {transform_indices = @transform_3, window_bounds = array<i64: 8, 2048>}]} {
    %c0 = arith.constant 0 : index
    %c0_0 = arith.constant 0 : index
    %0 = vector.load %arg2[%c0, %c0_0] : memref<8x2048xf32, #tpu.memory_space<vmem>>, vector<8x2048xf32>
    %c0_1 = arith.constant 0 : index
    %c0_2 = arith.constant 0 : index
    %1 = vector.load %arg3[%c0_1, %c0_2] : memref<8x1xf32, #tpu.memory_space<vmem>>, vector<8x1xf32>
    %2 = vector.broadcast %1 : vector<8x1xf32> to vector<8x2048xf32>
    %3 = arith.mulf %0, %2 : vector<8x2048xf32>
    %c0_3 = arith.constant 0 : index
    %c0_4 = arith.constant 0 : index
    %4 = vector.load %arg4[%c0_3, %c0_4] : memref<8x1xf32, #tpu.memory_space<vmem>>, vector<8x1xf32>
    %5 = vector.broadcast %4 : vector<8x1xf32> to vector<8x2048xf32>
    %6 = arith.addf %3, %5 : vector<8x2048xf32>
    %c0_5 = arith.constant 0 : index
    %c0_6 = arith.constant 0 : index
    %7 = vector.load %arg5[%c0_5, %c0_6] : memref<8x2048xf32, #tpu.memory_space<vmem>>, vector<8x2048xf32>
    tpu.vector_store %arg5[%c0_5, %c0_6], %6 {strides = array<i32>} : memref<8x2048xf32, #tpu.memory_space<vmem>>, vector<8x2048xf32>,
    return
  }
  func.func @transform_0(%arg0: i32, %arg1: i32) -> (i32, i32) {
    %c0_i32 = arith.constant 0 : i32
    return %arg0, %arg1 : i32, i32
  }
  func.func @transform_1(%arg0: i32, %arg1: i32) -> (i32, i32) {
    %c0_i32 = arith.constant 0 : i32
    %c0_i32_0 = arith.constant 0 : i32
    return %arg0, %c0_i32 : i32, i32
  }
  func.func @transform_2(%arg0: i32, %arg1: i32) -> (i32, i32) {
    %c0_i32 = arith.constant 0 : i32
    %c0_i32_0 = arith.constant 0 : i32
    return %arg0, %c0_i32 : i32, i32
  }
  func.func @transform_3(%arg0: i32, %arg1: i32) -> (i32, i32) {
    %c0_i32 = arith.constant 0 : i32
    return %arg0, %arg1 : i32, i32
  }
}

</mosaic_0001>

<bundles_post_ra>
// kernel: tpu_custom_call.1
= control target key start
LH: loop header
LB: loop body
LE: loop exit
PB: predicated region body
PF: predicated region fallthrough
CT: control target
= control target key end

     0   :  { %8 = vsyncpa [#allocation3], 0  ;;  %s869_s0 = inlined_call_operand.hbm [shape: f32[8,4096], index: 0, kind: input, shape index: {}]   ;;  %s870_s1 = inlined_call_operand.vmem [shape: f32[8,1], index: 1, kind: input, shape index: {}]   ;;  %s871_s2 = inlined_call_operand.vmem [shape: f32[8,1], index: 2, kind: input, shape index: {}]   ;;  %s872_s3 = inlined_call_operand.hbm [shape: f32[8,4096], index: 3, kind: output, shape index: {}]  }
   0x1   :  { %10 = vsyncpa [#allocation3 + $0x1], 0 }
   0x2   :  { %11 = vsyncpa [#allocation4], 0 }
   0x3   :  { %13 = vsyncpa [#allocation4 + $0x1], 0  ;;  %s668_s12 = smov 0   ;;  %s670_s13 = smov 0  }
   0x4   :  { %s672_s14 = smov 0   ;;  %s674_s15 = smov 0  }
   0x5   :  { %s676_s16 = smov 0   ;;  %s678_s17 = smov 0  }
   0x6 LB: > { %s448_s18 = sadd.s32 4294967295, %s643_s17   ;;  %s449_s19 = sadd.s32 4294967294, %s643_s17   ;;  %s643_s17 = sphi %s678_s17, %s19_s17   ;;  %s639_s16 = sphi %s676_s16, %s888_s16   ;;  %s635_s15 = sphi %s674_s15, %s887_s15   ;;  %s631_s14 = sphi %s672_s14, %s886_s14   ;;  %s627_s13 = sphi %s670_s13, %s885_s13   ;;  %s623_s12 = sphi %s668_s12, %s884_s12  }
   0x7   : > { %s28_s20 = sadd.s32 1, %s639_s16  ;;  %s40_s21 = sadd.s32 1, %s631_s14 }
   0x8   : > { %p29_p0 = scmp.ge.s32.totalorder %s28_s20, 2  ;;  %p47_p1 = scmp.ne.s32.totalorder %s631_s14, %s627_s13 }
   0x9   : > { %p48_p2 = scmp.eq.s32.totalorder %s643_s17, 0  ;;  %p53_p3 = scmp.ne.s32.totalorder %s627_s13, %s623_s12 }
   0xa   : > { %s890_s20 = smov (%p29_p0, %s28_s20), 0  ;;  %p54_p5 = scmp.eq.s32.totalorder %s448_s18, 0 }
   0xb   : > { %p709_p4 = por %p48_p2, %p47_p1  ;;  %s36_s23 = ssub.s32 %s639_s16, %s890_s20 }
   0xc   : > { %p131_p6 = scmp.eq.s32.totalorder %s448_s18, 1  ;;  %p38_p7 = scmp.eq.s32.totalorder %s36_s23, 0 }
   0xd   : > { %p715_p8 = por %p54_p5, %p53_p3  ;;  %p137_p10 = scmp.eq.s32.totalorder %s449_s19, 1 }
   0xe   : > { %p719_p9 = por %p131_p6, %p47_p1  ;;  %p479_p13 = scmp.lt.s32.totalorder %s643_s17, 2 }
   0xf   : > { %s724_s26 = scalar_select %p38_p7, %s631_s14, %s40_s21  }
  0x10   : > { %s876_s25 = scalar_select %p719_p9, 1, 0 }
  0x11   : > { %p726_p11 = por %p137_p10, %p53_p3  ;;  %s171_s28 = sand.u32 1, %s631_s14  }
  0x12   : > { %s454_s29 = sshll.u32 %s171_s28, 7  ;;  %s465_s30 = sshll.u32 %s639_s16, 11 }
  0x13   : > { %s877_s27 = scalar_select %p726_p11, 1, 0 }
  0x14   : > { %s737_s6 = scalar_lea.hbm %s869_s0, %s465_s30  ;;  %s175_s7 = scalar_lea.vmem [#allocation2], %s454_s29 }
  0x15   : > { %s185_s8 = sshll.u32 %s175_s7, 4  ;;  %p743_p0 = pnand %p479_p13, %p709_p4  ;;  %s739_s8 = int_to_ptr.vmem [resolvable:$true] %s185_s8 }
  0x16   : > { %s172_s10 = scalar_lea.sflag [#allocation3], %s171_s28  ;;  %s531_s11 = scalar_lea.hbm %s737_s6, 2048 }
  0x17   : > { %p532_p3 = scmp.ne.s32.totalorder %s737_s6, %s531_s11  ;;  %p533_p5 = pneg %p743_p0 }
  0x18   : > { %s536_s21 = scalar_lea.hbm %s869_s0, 4096  ;;  %p537_p4 = scmp.lt.u32.totalorder %s737_s6, %s869_s0 }
  0x19   : > { %p534_p6 = pnand %p533_p5, %p532_p3  ;;  %p538_p10 = scmp.lt.u32.totalorder %s536_s21, %s531_s11 }
  0x1a   : > { %p540_p12 = scmp.lt.u32.totalorder %s531_s11, %s737_s6 }
  0x1b   : > { %p535_p7 = pneg %p534_p6  ;;  %p539_p13 = por %p538_p10, %p537_p4 }
  0x1d   : > { %p541_p1 = por %p540_p12, %p539_p13 }
  0x1f   : > { %p542_p2 = pnand %p541_p1, %p535_p7 }
  0x21   : > { %545 = shalt.err (!%p542_p2)
}
  0x22   : > { %s546_s28 = scalar_lea.vmem %s739_s8, 2048  ;;  %s645_s29 = smov [#allocation2]  }
  0x23   : > { %p547_p3 = scmp.ne.s32.totalorder %s739_s8, %s546_s28  ;;  %s551_s30 = sshll.u32 %s645_s29, 4  ;;  %s552_s30 = int_to_ptr.vmem [resolvable:$false] %s551_s30 }
  0x24   : > { %s553_s4 = scalar_lea.vmem %s552_s30, 4096  ;;  %p554_p9 = scmp.lt.s32.totalorder %s739_s8, %s552_s30 }
  0x25   : > { %p549_p6 = pnand %p547_p3, %p533_p5  ;;  %p555_p4 = scmp.lt.s32.totalorder %s553_s4, %s546_s28 }
  0x27   : > { %p550_p11 = pneg %p549_p6  ;;  %p556_p10 = por %p555_p4, %p554_p9 }
  0x29   : > { %p557_p12 = pnand %p556_p10, %p550_p11 }
  0x2b   : > { %560 = shalt.err (!%p557_p12)
}
  0x2c   : > { %474 = dma.hbm_to_vmem [thread:$0]  (!%p743_p0), %s737_s6, 2048, %s739_s8, %s172_s10  }
  0x2d   : > { %p879_p1 = scmp.lt.s32.totalorder %s643_s17, 3  ;;  %p880_p2 = scmp.ge.s32.totalorder %s643_s17, 1 }
  0x2f   : > { %p191_p5 = pnand %p880_p2, %p879_p1 }
  0x30   : > { %s779_s5 = sand.u32 (!%p191_p5), 1, %s627_s13  }
  0x31   : > { %194 = sbr.rel (%p191_p5) target bundleno = 215 (0xd7), region = 32  ;;  %s458_s7 = sshll.u32 (!%p191_p5), %s779_s5, 7 }
  0x32   : > { %s197_s11 = scalar_lea.sflag (!%p191_p5), [#allocation3], %s779_s5  ;;  %s200_s9 = scalar_lea.vmem (!%p191_p5), [#allocation2], %s458_s7 }
  0x38   : > { %614 = dma.done.wait (%p715_p8), %s197_s11, 2048  }
  0x39   : > { %616 = vsyncadd (%p715_p8), %s197_s11, 4294965248  ;;  %v646_v0 = vmov 0   ;;  %v257_v1 = vld [vmem:[%s870_s1] sm:$0xff]  ;;  %v242_v4 = vld [vmem:[%s200_s9 + $0x8] sm:$0xff]  ;;  %s466_s24 = sshll.u32 %s635_s15, 11  ;;  %s798_s19 = scalar_lea.vmem [#allocation5], %s458_s7 }
  0x3a   : > { %530 = vset.pattern.permute.xlu0 %v646_v0  ;;  %v279_v2 = vld [vmem:[%s871_s2] sm:$0xff]  ;;  %v243_v5 = vld [vmem:[%s200_s9 + $0x10] sm:$0xff]  ;;  %v244_v6 = vld [vmem:[%s200_s9 + $0x18] sm:$0xff]  ;;  %s334_s21 = sshll.u32 %s798_s19, 4  ;;  %s812_s23 = scalar_lea.hbm %s872_s3, %s466_s24  ;;  %s814_s21 = int_to_ptr.vmem [resolvable:$true] %s334_s21 }
  0x3b   : > { %260 = vperm.xlu0 %530, %v257_v1   ;;  %v241_v3 = vld [vmem:[%s200_s9] sm:$0xff]  ;;  %v246_v8 = vld [vmem:[%s200_s9 + $0x28] sm:$0xff]  ;;  %v247_v9 = vld [vmem:[%s200_s9 + $0x30] sm:$0xff]  ;;  %s318_s28 = scalar_lea.sflag [#allocation4], %s779_s5  ;;  %s561_s29 = scalar_lea.vmem %s814_s21, 2048 }
  0x3c   : > { %v245_v7 = vld [vmem:[%s200_s9 + $0x20] sm:$0xff]  ;;  %v248_v10 = vld [vmem:[%s200_s9 + $0x38] sm:$0xff]  ;;  %v250_v12 = vld [vmem:[%s200_s9 + $0x48] sm:$0xff]  ;;  %p562_p8 = scmp.ne.s32.totalorder %s814_s21, %s561_s29  ;;  %p881_p9 = scmp.ne.s32.totalorder %s876_s25, 0 }
  0x3d   : > { %v249_v11 = vld [vmem:[%s200_s9 + $0x40] sm:$0xff]  ;;  %v251_v14 = vld [vmem:[%s200_s9 + $0x50] sm:$0xff]  ;;  %v252_v15 = vld [vmem:[%s200_s9 + $0x58] sm:$0xff]  ;;  %s647_s30 = smov [#allocation5]  }
  0x3e   : > { %v253_v16 = vld [vmem:[%s200_s9 + $0x60] sm:$0xff]  ;;  %v254_v17 = vld [vmem:[%s200_s9 + $0x68] sm:$0xff]  ;;  %v255_v18 = vld [vmem:[%s200_s9 + $0x70] sm:$0xff]  ;;  %p563_p11 = pnand %p562_p8, %p881_p9  ;;  %s565_s4 = sshll.u32 %s647_s30, 4  ;;  %s566_s4 = int_to_ptr.vmem [resolvable:$false] %s565_s4 }
  0x3f   : > { %282 = vperm.xlu0 %530, %v279_v2   ;;  %v256_v19 = vld [vmem:[%s200_s9 + $0x78] sm:$0xff]  ;;  %s567_s7 = scalar_lea.vmem %s566_s4, 4096  ;;  %p568_p7 = scmp.lt.s32.totalorder %s814_s21, %s566_s4 }
  0x40   : > { %p564_p0 = pneg %p563_p11  ;;  %p569_p13 = scmp.lt.s32.totalorder %s567_s7, %s561_s29 }
  0x42   : > { %p570_p3 = por %p569_p13, %p568_p7 }
  0x44   : > { %p571_p6 = pnand %p570_p3, %p564_p0 }
  0xba   : > { %v261_v13 = vpop.permute.xlu0 %260 }
  0xbb   : > { %v263_v20 = vmul.f32 %v261_v13, %v241_v3  ;;  %v264_v21 = vmul.f32 %v261_v13, %v242_v4  ;;  %v265_v22 = vmul.f32 %v261_v13, %v243_v5  ;;  %v266_v23 = vmul.f32 %v261_v13, %v244_v6 }
  0xbc   : > { %v267_v24 = vmul.f32 %v261_v13, %v245_v7  ;;  %v268_v25 = vmul.f32 %v261_v13, %v246_v8  ;;  %v269_v26 = vmul.f32 %v261_v13, %v247_v9  ;;  %v270_v27 = vmul.f32 %v261_v13, %v248_v10 }
  0xbd   : > { %v271_v28 = vmul.f32 %v261_v13, %v249_v11  ;;  %v272_v29 = vmul.f32 %v261_v13, %v250_v12  ;;  %v273_v30 = vmul.f32 %v261_v13, %v251_v14  ;;  %v274_v31 = vmul.f32 %v261_v13, %v252_v15 }
  0xbe   : > { %v283_v32 = vpop.permute.xlu0 %282  ;;  %v275_v33 = vmul.f32 %v261_v13, %v253_v16  ;;  %v276_v34 = vmul.f32 %v261_v13, %v254_v17  ;;  %v277_v35 = vmul.f32 %v261_v13, %v255_v18  ;;  %v278_v36 = vmul.f32 %v261_v13, %v256_v19 }
  0xbf   : > { %v285_v37 = vadd.f32 %v283_v32, %v263_v20  ;;  %v286_v38 = vadd.f32 %v283_v32, %v264_v21  ;;  %v287_v39 = vadd.f32 %v283_v32, %v265_v22  ;;  %v288_v40 = vadd.f32 %v283_v32, %v266_v23 }
  0xc0   : > { %v289_v41 = vadd.f32 %v283_v32, %v267_v24  ;;  %v290_v42 = vadd.f32 %v283_v32, %v268_v25  ;;  %v291_v43 = vadd.f32 %v283_v32, %v269_v26  ;;  %v292_v44 = vadd.f32 %v283_v32, %v270_v27 }
  0xc1   : > { %v293_v45 = vadd.f32 %v283_v32, %v271_v28  ;;  %v294_v46 = vadd.f32 %v283_v32, %v272_v29  ;;  %v295_v47 = vadd.f32 %v283_v32, %v273_v30  ;;  %v296_v48 = vadd.f32 %v283_v32, %v274_v31  ;;  %301 = vst [vmem:[%s798_s19] sm:$0xff] %v285_v37 }
  0xc2   : > { %302 = vst [vmem:[%s798_s19 + $0x8] sm:$0xff] %v286_v38  ;;  %303 = vst [vmem:[%s798_s19 + $0x10] sm:$0xff] %v287_v39  ;;  %v297_v49 = vadd.f32 %v283_v32, %v275_v33  ;;  %v298_v50 = vadd.f32 %v283_v32, %v276_v34  ;;  %v299_v51 = vadd.f32 %v283_v32, %v277_v35 }
  0xc3   : > { %304 = vst [vmem:[%s798_s19 + $0x18] sm:$0xff] %v288_v40  ;;  %v300_v52 = vadd.f32 %v283_v32, %v278_v36  ;;  %305 = vst [vmem:[%s798_s19 + $0x20] sm:$0xff] %v289_v41 }
  0xc4   : > { %306 = vst [vmem:[%s798_s19 + $0x28] sm:$0xff] %v290_v42  ;;  %307 = vst [vmem:[%s798_s19 + $0x30] sm:$0xff] %v291_v43 }
  0xc5   : > { %308 = vst [vmem:[%s798_s19 + $0x38] sm:$0xff] %v292_v44  ;;  %309 = vst [vmem:[%s798_s19 + $0x40] sm:$0xff] %v293_v45 }
  0xc6   : > { %310 = vst [vmem:[%s798_s19 + $0x48] sm:$0xff] %v294_v46  ;;  %311 = vst [vmem:[%s798_s19 + $0x50] sm:$0xff] %v295_v47 }
  0xc7   : > { %312 = vst [vmem:[%s798_s19 + $0x58] sm:$0xff] %v296_v48  ;;  %313 = vst [vmem:[%s798_s19 + $0x60] sm:$0xff] %v297_v49 }
  0xc8   : > { %314 = vst [vmem:[%s798_s19 + $0x68] sm:$0xff] %v298_v50  ;;  %315 = vst [vmem:[%s798_s19 + $0x70] sm:$0xff] %v299_v51 }
  0xc9   : > { %316 = vst [vmem:[%s798_s19 + $0x78] sm:$0xff] %v300_v52 }
  0xca   : > { %574 = shalt.err (!%p571_p6)
}
  0xcb   : > { %s575_s5 = scalar_lea.hbm %s812_s23, 2048  ;;  %s579_s6 = scalar_lea.hbm %s872_s3, 4096 }
  0xcc   : > { %p576_p4 = scmp.ne.s32.totalorder %s812_s23, %s575_s5  ;;  %p580_p1 = scmp.lt.u32.totalorder %s812_s23, %s872_s3 }
  0xcd   : > { %p581_p2 = scmp.lt.u32.totalorder %s579_s6, %s575_s5  ;;  %p583_p8 = scmp.lt.u32.totalorder %s575_s5, %s812_s23 }
  0xce   : > { %p577_p10 = pnand %p576_p4, %p881_p9 }
  0xcf   : > { %p582_p5 = por %p581_p2, %p580_p1 }
  0xd0   : > { %p578_p12 = pneg %p577_p10 }
  0xd1   : > { %p584_p11 = por %p583_p8, %p582_p5 }
  0xd3   : > { %p585_p0 = pnand %p584_p11, %p578_p12 }
  0xd5   : > { %588 = shalt.err (!%p585_p0)
}
  0xd6   : > { %469 = dma.vmem_to_hbm [thread:$0]  (%p881_p9), %s814_s21, 2048, %s812_s23, %s318_s28  }
  0xd7 PF: > { %s346_s18 = sand.u32 1, %s623_s12   ;;  %p882_p7 = scmp.ne.s32.totalorder %s877_s27, 0 }
  0xd8   : > { %p883_p13 = scmp.ge.s32.totalorder %s643_s17, 2  ;;  %s347_s24 = scalar_lea.sflag [#allocation4], %s346_s18 }
  0xda   : > { %p476_p3 = pnand %p883_p13, %p882_p7 }
  0xdc   : > { %618 = dma.done.wait (!%p476_p3), %s347_s24, 2048  }
  0xdd   : > { %620 = vsyncadd (!%p476_p3), %s347_s24, 4294965248  ;;  %s19_s17 = sadd.s32 1, %s643_s17   ;;  %s884_s12 = smov %s627_s13 }
  0xde   : > { %p16_p6 = scmp.ge.s32.totalorder %s19_s17, 4   ;;  %s885_s13 = smov %s631_s14 }
  0xdf   : > { %s886_s14 = smov %s724_s26  ;;  %s887_s15 = smov %s639_s16 }
  0xe0   : > { %s888_s16 = smov %s890_s20  ;;  %18 = sbr.rel (!%p16_p6) target bundleno = 6 (0x6), region = 83 }
  0xe7   :  { %352 = vsyncpa [#allocation3], 1 }
  0xe8   :  { %354 = vsyncpa [#allocation3 + $0x1], 1 }
  0xe9   :  { %355 = vsyncpa [#allocation4], 1 }
  0xea   :  { %357 = vsyncpa [#allocation4 + $0x1], 1 }

</bundles_post_ra>
